<compile_context>
chip_gen: v5e
topology: v5e:2x2
jax: 0.10.0
libtpu: 0.0.40
codegen_flags: <defaults>
</compile_context>

<pallas_src>
import jax
import jax.numpy as jnp
from jax.experimental import pallas as pl
from jax.experimental.pallas import tpu as pltpu


def _laplacian_kernel(scale_ref, xt_ref, y_ref, o_ref):
    # scale_ref : SMEM (1,)   holding -1/sigma2            (scalar prefetch)
    # xt_ref    : (tn, d)     tile of X^T (samples on sublanes, features on lanes)
    # y_ref     : (d, tm)     tile of Y   (features on sublanes, M on lanes)
    # o_ref     : (tn, tm)    output tile (lane-dense along M)
    x = xt_ref[...].astype(jnp.float32)
    y = y_ref[...].astype(jnp.float32)
    d = x.shape[1]

    # Unrolled accumulation over the (small, trace-time-constant) feature dim.
    # Two independent accumulators keep the VPU add chain short; the compiler
    # interleaves the many (tn, tm) vregs on the 4 VALU slots.
    acc0 = jnp.abs(x[:, 0:1] - y[0:1, :])                     # (tn, tm)
    acc1 = None
    for k in range(1, d):
        term = jnp.abs(x[:, k:k + 1] - y[k:k + 1, :])
        if k % 2 == 1:
            acc1 = term if acc1 is None else acc1 + term
        else:
            acc0 = acc0 + term
    dist = acc0 if acc1 is None else acc0 + acc1

    # Single fused scale, then EUP exp (separate issue slot -> ~free).
    o_ref[...] = jnp.exp(dist * scale_ref[0]).astype(o_ref.dtype)


def _round_up(x, m):
    return ((x + m - 1) // m) * m


def laplacian_kernel_matrix(X, Y=None, sigma2=50.0, *, tn=256, tm=1024):
    """X: (d, N), Y: (d, M) -> (N, M) kernel matrix, matching the torch module."""
    if Y is None:
        Y = X
    X = jnp.asarray(X, jnp.float32)
    Y = jnp.asarray(Y, jnp.float32)
    if X.ndim == 1:      # single sample: treat as (d, 1), N = 1 (torch branch)
        X = X[:, None]
    if Y.ndim == 1:
        Y = Y[:, None]
    d, N = X.shape
    d2, M = Y.shape
    assert d == d2, "X and Y must share the feature dimension d"

    # Tile sizes: N tiles on sublanes (multiple of 8), M tiles on lanes (mult of 128).
    tn = min(tn, _round_up(N, 8))
    tm = min(tm, _round_up(M, 128))
    n_tiles = pl.cdiv(N, tn)
    m_tiles = pl.cdiv(M, tm)
    Np, Mp = n_tiles * tn, m_tiles * tm

    # Ragged edges handled by zero-padding; padded rows/cols are sliced off after.
    Xt = X.T                                    # (N, d)
    if Np != N:
        Xt = jnp.pad(Xt, ((0, Np - N), (0, 0)))
    Yp = Y                                      # (d, M): keep M on the lane axis
    if Mp != M:
        Yp = jnp.pad(Yp, ((0, 0), (0, Mp - M)))

    # Hoisted scalar: -1/sigma2 (sigma2 may be a python float or a jax scalar).
    scale = (-1.0 / jnp.asarray(sigma2, jnp.float32)).reshape(1)

    grid_spec = pltpu.PrefetchScalarGridSpec(
        num_scalar_prefetch=1,
        grid=(n_tiles, m_tiles),
        in_specs=[
            pl.BlockSpec((tn, d), lambda i, j, s: (i, 0)),    # X^T row tile
            pl.BlockSpec((d, tm), lambda i, j, s: (0, j)),    # Y col tile (lane-dense M)
        ],
        out_specs=pl.BlockSpec((tn, tm), lambda i, j, s: (i, j)),
    )

    out = pl.pallas_call(
        _laplacian_kernel,
        out_shape=jax.ShapeDtypeStruct((Np, Mp), jnp.float32),
        grid_spec=grid_spec,
        compiler_params=pltpu.CompilerParams(
            dimension_semantics=("parallel", "parallel"),
            vmem_limit_bytes=32 * 1024 * 1024,
        ),
    )(scale, Xt, Yp)

    if Np != N or Mp != M:
        out = out[:N, :M]
    return out


def _reference(X, Y, sigma2):
    Xt = X.T[:, None, :]   # (N, 1, d)
    Yt = Y.T[None, :, :]   # (1, M, d)
    dist = jnp.sum(jnp.abs(Xt - Yt), axis=-1)
    return jnp.exp(-dist / sigma2)


if __name__ == "__main__":
    key = jax.random.PRNGKey(0)
    kx, ky, kx2, ky2 = jax.random.split(key, 4)

    sigma2 = 50.0           # matches nn.Parameter(torch.tensor(50.0))

    # Small, ragged shapes (single padded tile path).
    d, N, M = 8, 48, 20
    X = jax.random.normal(kx, (d, N), dtype=jnp.float32)
    Y = jax.random.normal(ky, (d, M), dtype=jnp.float32)
    out = jax.block_until_ready(laplacian_kernel_matrix(X, Y, sigma2))
    ref = _reference(X, Y, sigma2)
    assert out.shape == (N, M)
    assert jnp.allclose(out, ref, atol=1e-5, rtol=1e-5)

    # Y=None (self-kernel) path.
    out_self = jax.block_until_ready(laplacian_kernel_matrix(X, None, sigma2))
    assert jnp.allclose(out_self, _reference(X, X, sigma2), atol=1e-5, rtol=1e-5)

    # Multi-tile path (exercises the grid along both axes with ragged edges).
    d2_, N2, M2 = 6, 300, 260
    X2 = jax.random.normal(kx2, (d2_, N2), dtype=jnp.float32)
    Y2 = jax.random.normal(ky2, (d2_, M2), dtype=jnp.float32)
    out2 = jax.block_until_ready(
        laplacian_kernel_matrix(X2, Y2, sigma2, tn=128, tm=128))
    assert out2.shape == (N2, M2)
    assert jnp.allclose(out2, _reference(X2, Y2, sigma2), atol=1e-5, rtol=1e-5)

    print("KERNEL_OK")
</pallas_src>

<mosaic_0001>
module attributes {stable_mosaic.version = 11 : i64} {
  func.func @_laplacian_kernel(%arg0: i32, %arg1: i32, %arg2: memref<1xf32, #tpu.memory_space<smem>>, %arg3: memref<48x8xf32, #tpu.memory_space<vmem>>, %arg4: memref<8x128xf32, #tpu.memory_space<vmem>>, %arg5: memref<48x128xf32, #tpu.memory_space<vmem>>) attributes {dimension_semantics = [#tpu.dimension_semantics<parallel>, #tpu.dimension_semantics<parallel>], iteration_bounds = array<i64: 1, 1>, scalar_prefetch = 1 : i64, scratch_operands = 0 : i64, tpu.core_type = #tpu.core_type<tc>, window_params = [{transform_indices = @transform_0, window_bounds = array<i64: 48, 8>}, {transform_indices = @transform_1, window_bounds = array<i64: 8, 128>}, {transform_indices = @transform_2, window_bounds = array<i64: 48, 128>}]} {
    %c0 = arith.constant 0 : index
    %c0_0 = arith.constant 0 : index
    %0 = vector.load %arg3[%c0, %c0_0] : memref<48x8xf32, #tpu.memory_space<vmem>>, vector<48x8xf32>
    %c0_1 = arith.constant 0 : index
    %c0_2 = arith.constant 0 : index
    %1 = vector.load %arg4[%c0_1, %c0_2] : memref<8x128xf32, #tpu.memory_space<vmem>>, vector<8x128xf32>
    %2 = vector.extract_strided_slice %0 {offsets = [0, 0], sizes = [48, 1], strides = [1, 1]} : vector<48x8xf32> to vector<48x1xf32>
    %3 = vector.extract_strided_slice %1 {offsets = [0, 0], sizes = [1, 128], strides = [1, 1]} : vector<8x128xf32> to vector<1x128xf32>
    %4 = vector.broadcast %2 : vector<48x1xf32> to vector<48x128xf32>
    %5 = vector.broadcast %3 : vector<1x128xf32> to vector<48x128xf32>
    %6 = arith.subf %4, %5 : vector<48x128xf32>
    %7 = math.absf %6 : vector<48x128xf32>
    %8 = vector.extract_strided_slice %0 {offsets = [0, 1], sizes = [48, 1], strides = [1, 1]} : vector<48x8xf32> to vector<48x1xf32>
    %9 = vector.extract_strided_slice %1 {offsets = [1, 0], sizes = [1, 128], strides = [1, 1]} : vector<8x128xf32> to vector<1x128xf32>
    %10 = vector.broadcast %8 : vector<48x1xf32> to vector<48x128xf32>
    %11 = vector.broadcast %9 : vector<1x128xf32> to vector<48x128xf32>
    %12 = arith.subf %10, %11 : vector<48x128xf32>
    %13 = math.absf %12 : vector<48x128xf32>
    %14 = vector.extract_strided_slice %0 {offsets = [0, 2], sizes = [48, 1], strides = [1, 1]} : vector<48x8xf32> to vector<48x1xf32>
    %15 = vector.extract_strided_slice %1 {offsets = [2, 0], sizes = [1, 128], strides = [1, 1]} : vector<8x128xf32> to vector<1x128xf32>
    %16 = vector.broadcast %14 : vector<48x1xf32> to vector<48x128xf32>
    %17 = vector.broadcast %15 : vector<1x128xf32> to vector<48x128xf32>
    %18 = arith.subf %16, %17 : vector<48x128xf32>
    %19 = math.absf %18 : vector<48x128xf32>
    %20 = arith.addf %7, %19 : vector<48x128xf32>
    %21 = vector.extract_strided_slice %0 {offsets = [0, 3], sizes = [48, 1], strides = [1, 1]} : vector<48x8xf32> to vector<48x1xf32>
    %22 = vector.extract_strided_slice %1 {offsets = [3, 0], sizes = [1, 128], strides = [1, 1]} : vector<8x128xf32> to vector<1x128xf32>
    %23 = vector.broadcast %21 : vector<48x1xf32> to vector<48x128xf32>
    %24 = vector.broadcast %22 : vector<1x128xf32> to vector<48x128xf32>
    %25 = arith.subf %23, %24 : vector<48x128xf32>
    %26 = math.absf %25 : vector<48x128xf32>
    %27 = arith.addf %13, %26 : vector<48x128xf32>
    %28 = vector.extract_strided_slice %0 {offsets = [0, 4], sizes = [48, 1], strides = [1, 1]} : vector<48x8xf32> to vector<48x1xf32>
    %29 = vector.extract_strided_slice %1 {offsets = [4, 0], sizes = [1, 128], strides = [1, 1]} : vector<8x128xf32> to vector<1x128xf32>
    %30 = vector.broadcast %28 : vector<48x1xf32> to vector<48x128xf32>
    %31 = vector.broadcast %29 : vector<1x128xf32> to vector<48x128xf32>
    %32 = arith.subf %30, %31 : vector<48x128xf32>
    %33 = math.absf %32 : vector<48x128xf32>
    %34 = arith.addf %20, %33 : vector<48x128xf32>
    %35 = vector.extract_strided_slice %0 {offsets = [0, 5], sizes = [48, 1], strides = [1, 1]} : vector<48x8xf32> to vector<48x1xf32>
    %36 = vector.extract_strided_slice %1 {offsets = [5, 0], sizes = [1, 128], strides = [1, 1]} : vector<8x128xf32> to vector<1x128xf32>
    %37 = vector.broadcast %35 : vector<48x1xf32> to vector<48x128xf32>
    %38 = vector.broadcast %36 : vector<1x128xf32> to vector<48x128xf32>
    %39 = arith.subf %37, %38 : vector<48x128xf32>
    %40 = math.absf %39 : vector<48x128xf32>
    %41 = arith.addf %27, %40 : vector<48x128xf32>
    %42 = vector.extract_strided_slice %0 {offsets = [0, 6], sizes = [48, 1], strides = [1, 1]} : vector<48x8xf32> to vector<48x1xf32>
    %43 = vector.extract_strided_slice %1 {offsets = [6, 0], sizes = [1, 128], strides = [1, 1]} : vector<8x128xf32> to vector<1x128xf32>
    %44 = vector.broadcast %42 : vector<48x1xf32> to vector<48x128xf32>
    %45 = vector.broadcast %43 : vector<1x128xf32> to vector<48x128xf32>
    %46 = arith.subf %44, %45 : vector<48x128xf32>
    %47 = math.absf %46 : vector<48x128xf32>
    %48 = arith.addf %34, %47 : vector<48x128xf32>
    %49 = vector.extract_strided_slice %0 {offsets = [0, 7], sizes = [48, 1], strides = [1, 1]} : vector<48x8xf32> to vector<48x1xf32>
    %50 = vector.extract_strided_slice %1 {offsets = [7, 0], sizes = [1, 128], strides = [1, 1]} : vector<8x128xf32> to vector<1x128xf32>
    %51 = vector.broadcast %49 : vector<48x1xf32> to vector<48x128xf32>
    %52 = vector.broadcast %50 : vector<1x128xf32> to vector<48x128xf32>
    %53 = arith.subf %51, %52 : vector<48x128xf32>
    %54 = math.absf %53 : vector<48x128xf32>
    %55 = arith.addf %41, %54 : vector<48x128xf32>
    %56 = arith.addf %48, %55 : vector<48x128xf32>
    %c0_3 = arith.constant 0 : index
    %57 = memref.load %arg2[%c0_3] : memref<1xf32, #tpu.memory_space<smem>>
    %58 = vector.broadcast %57 : f32 to vector<48x128xf32>
    %59 = arith.mulf %56, %58 : vector<48x128xf32>
    %60 = math.exp %59 : vector<48x128xf32>
    %c0_4 = arith.constant 0 : index
    %c0_5 = arith.constant 0 : index
    %61 = vector.load %arg5[%c0_4, %c0_5] : memref<48x128xf32, #tpu.memory_space<vmem>>, vector<48x128xf32>
    tpu.vector_store %arg5[%c0_4, %c0_5], %60 {strides = array<i32>} : memref<48x128xf32, #tpu.memory_space<vmem>>, vector<48x128xf32>,
    return
  }
  func.func @transform_0(%arg0: i32, %arg1: i32, %arg2: memref<1xf32, #tpu.memory_space<smem>>) -> (i32, i32) {
    %c0_i32 = arith.constant 0 : i32
    %c0_i32_0 = arith.constant 0 : i32
    return %arg0, %c0_i32 : i32, i32
  }
  func.func @transform_1(%arg0: i32, %arg1: i32, %arg2: memref<1xf32, #tpu.memory_space<smem>>) -> (i32, i32) {
    %c0_i32 = arith.constant 0 : i32
    %c0_i32_0 = arith.constant 0 : i32
    return %c0_i32, %arg1 : i32, i32
  }
  func.func @transform_2(%arg0: i32, %arg1: i32, %arg2: memref<1xf32, #tpu.memory_space<smem>>) -> (i32, i32) {
    %c0_i32 = arith.constant 0 : i32
    return %arg0, %arg1 : i32, i32
  }
}

</mosaic_0001>

<bundles_post_ra>
// kernel: tpu_custom_call.1
= control target key start
LH: loop header
LB: loop body
LE: loop exit
PB: predicated region body
PF: predicated region fallthrough
CT: control target
= control target key end

     0   :  { %v482_v3 = vmov 0   ;;  %s757_s0 = inlined_call_operand.<no memory space> [shape: f32[1], index: 0, kind: input, shape index: {}]   ;;  %s758_s1 = inlined_call_operand.vmem [shape: f32[48,8], index: 1, kind: input, shape index: {}]   ;;  %s759_s2 = inlined_call_operand.vmem [shape: f32[8,128], index: 2, kind: input, shape index: {}]   ;;  %s760_s3 = inlined_call_operand.hbm [shape: f32[48,128], index: 3, kind: output, shape index: {}]  }
   0x1   :  { %v516_v0 = vld [vmem:[%s758_s1 + $0x20] sm:$0xff]  ;;  %v521_v1 = vld [vmem:[%s758_s1 + $0x10] sm:$0xff]  ;;  %422 = vset.pattern.permute.xlu2 %v482_v3  ;;  %421 = vset.pattern.permute.xlu1 %v482_v3 }
   0x2   :  { %v526_v2 = vld [vmem:[%s758_s1] sm:$0xff]  ;;  %420 = vset.pattern.permute.xlu0 %v482_v3  ;;  %43 = vperm.xlu2 %422, %v516_v0  }
   0x3   :  { %9 = vsyncpa [#allocation5], 0  ;;  %33 = vperm.xlu1 %421, %v521_v1   ;;  %23 = vperm.xlu0 %420, %v526_v2   ;;  %v534_v4 = vld [vmem:[%s758_s1 + $0x28] sm:$0xff]  ;;  %v539_v5 = vld [vmem:[%s758_s1 + $0x18] sm:$0xff]  ;;  %v483_v7 = vmov 1   ;;  %v484_v8 = vmov 2  }
   0x4   :  { %v544_v6 = vld [vmem:[%s758_s1 + $0x8] sm:$0xff]  ;;  %v485_v9 = vmov 3   ;;  %v486_v10 = vmov 4   ;;  %v487_v11 = vmov 5   ;;  %v488_v12 = vmov 6   ;;  %v594_v20 = vld [vmem:[%s759_s2] sm:$0xff] }
   0x5   :  { %v489_v13 = vmov 7   ;;  %v599_v21 = vperm.slane %v594_v20, 0  ;;  %v602_v24 = vperm.slane %v594_v20, 2  ;;  %v623_v42 = vperm.slane %v594_v20, 1  ;;  %s397_s29 = sshll.u32 %s760_s3, 4  ;;  %s491_s30 = smov 128   ;;  %s398_s29 = int_to_ptr.hbm [resolvable:$true] %s397_s29 }
   0x6   :  { %v626_v43 = vperm.slane %v594_v20, 3  ;;  %s492_s4 = smov 8  }
   0xa   :  { %48 = vperm.xlu2 %422, %v534_v4  }
   0xb   :  { %38 = vperm.xlu1 %421, %v539_v5   ;;  %28 = vperm.xlu0 %420, %v544_v6  }
  0x12   :  { %425 = vset.pattern.permute.xlu2 %v483_v7 }
  0x13   :  { %424 = vset.pattern.permute.xlu1 %v483_v7  ;;  %423 = vset.pattern.permute.xlu0 %v483_v7 }
  0x14   :  { %73 = vperm.xlu2 %425, %v521_v1   ;;  %69 = vperm.xlu1 %424, %v544_v6  }
  0x15   :  { %65 = vperm.xlu0 %423, %v526_v2  }
  0x1c   :  { %81 = vperm.xlu2 %425, %v516_v0   ;;  %77 = vperm.xlu1 %424, %v539_v5  }
  0x1d   :  { %85 = vperm.xlu0 %423, %v534_v4  }
  0x24   :  { %427 = vset.pattern.permute.xlu2 %v484_v8  ;;  %426 = vset.pattern.permute.xlu1 %v484_v8 }
  0x25   :  { %428 = vset.pattern.permute.xlu0 %v484_v8  ;;  %106 = vperm.xlu2 %427, %v544_v6  }
  0x26   :  { %102 = vperm.xlu1 %426, %v526_v2   ;;  %110 = vperm.xlu0 %428, %v521_v1  }
  0x2d   :  { %118 = vperm.xlu2 %427, %v516_v0  }
  0x2e   :  { %114 = vperm.xlu1 %426, %v539_v5   ;;  %430 = vset.pattern.permute.xlu0 %v485_v9 }
  0x2f   :  { %149 = vperm.xlu0 %430, %v544_v6  }
  0x35   :  { %429 = vset.pattern.permute.xlu2 %v485_v9 }
  0x36   :  { %122 = vperm.xlu1 %426, %v534_v4   ;;  %145 = vperm.xlu2 %429, %v526_v2  }
  0x37   :  { %432 = vset.pattern.permute.xlu0 %v486_v10 }
  0x38   :  { %188 = vperm.xlu0 %432, %v526_v2  }
  0x3e   :  { %431 = vset.pattern.permute.xlu1 %v485_v9  ;;  %157 = vperm.xlu2 %429, %v539_v5  }
  0x3f   :  { %153 = vperm.xlu1 %431, %v521_v1  }
  0x40   :  { %208 = vperm.xlu0 %432, %v534_v4  }
  0x46   :  { %165 = vperm.xlu2 %429, %v534_v4  }
  0x47   :  { %161 = vperm.xlu1 %431, %v516_v0  }
  0x48   :  { %437 = vset.pattern.permute.xlu0 %v487_v11 }
  0x49   :  { %239 = vperm.xlu0 %437, %v521_v1  }
  0x4e   :  { %434 = vset.pattern.permute.xlu2 %v486_v10 }
  0x4f   :  { %433 = vset.pattern.permute.xlu1 %v486_v10  ;;  %196 = vperm.xlu2 %434, %v521_v1  }
  0x50   :  { %192 = vperm.xlu1 %433, %v544_v6  }
  0x51   :  { %439 = vset.pattern.permute.xlu0 %v488_v12 }
  0x52   :  { %278 = vperm.xlu0 %439, %v544_v6  }
  0x57   :  { %204 = vperm.xlu2 %434, %v516_v0  }
  0x58   :  { %200 = vperm.xlu1 %433, %v539_v5  }
  0x5a   :  { %441 = vset.pattern.permute.xlu0 %v489_v13 }
  0x5b   :  { %317 = vperm.xlu0 %441, %v526_v2  }
  0x5c   :  { %v44_v14 = vpop.permute.xlu2 %43 }
  0x5d   :  { %v56_v31 = vsub.f32 %v44_v14, %v599_v21 }
  0x5f   :  { %436 = vset.pattern.permute.xlu2 %v487_v11  ;;  %v62_v36 = vand.u32 2147483647, %v56_v31 }
  0x60   :  { %435 = vset.pattern.permute.xlu1 %v487_v11  ;;  %235 = vperm.xlu2 %436, %v544_v6  }
  0x61   :  { %231 = vperm.xlu1 %435, %v526_v2  }
  0x63   :  { %337 = vperm.xlu0 %441, %v534_v4  }
  0x64   :  { %v579_v15 = vpop.permute.xlu2 %48 }
  0x68   :  { %247 = vperm.xlu2 %436, %v516_v0  }
  0x69   :  { %243 = vperm.xlu1 %435, %v539_v5  }
  0x6e   :  { %v583_v16 = vpop.permute.xlu2 %73 }
  0x70   :  { %438 = vset.pattern.permute.xlu2 %v488_v12 }
  0x71   :  { %251 = vperm.xlu1 %435, %v534_v4   ;;  %274 = vperm.xlu2 %438, %v526_v2  }
  0x75   :  { %v34_v17 = vpop.permute.xlu1 %33  ;;  %v587_v18 = vpop.permute.xlu0 %23 }
  0x76   :  { %v589_v19 = vpop.permute.xlu2 %81  ;;  %v54_v44 = vsub.f32 %v34_v17, %v599_v21 }
  0x78   :  { %v60_v51 = vand.u32 2147483647, %v54_v44 }
  0x79   :  { %440 = vset.pattern.permute.xlu1 %v488_v12  ;;  %286 = vperm.xlu2 %438, %v539_v5  }
  0x7a   :  { %282 = vperm.xlu1 %440, %v521_v1  }
  0x7d   :  { %v39_v22 = vpop.permute.xlu1 %38  ;;  %v29_v23 = vpop.permute.xlu0 %28 }
  0x7e   :  { %v53_v25 = vsub.f32 %v29_v23, %v599_v21  ;;  %v55_v57 = vsub.f32 %v39_v22, %v599_v21 }
  0x7f   :  { %v107_v26 = vpop.permute.xlu2 %106 }
  0x80   :  { %v127_v27 = vsub.f32 %v107_v26, %v602_v24  ;;  %v59_v28 = vand.u32 2147483647, %v53_v25 }
  0x81   :  { %294 = vperm.xlu2 %438, %v534_v4  }
  0x82   :  { %v133_v29 = vand.u32 2147483647, %v127_v27  ;;  %290 = vperm.xlu1 %440, %v516_v0   ;;  %v667_v27 = vperm.slane %v594_v20, 4 }
  0x84   :  { %v608_v30 = vadd.f32 %v133_v29, %v59_v28  ;;  %v52_v28 = vsub.f32 %v587_v18, %v599_v21 }
  0x86   :  { %v70_v32 = vpop.permute.xlu1 %69 }
  0x87   :  { %v119_v33 = vpop.permute.xlu2 %118  ;;  %v611_v34 = vpop.permute.xlu0 %65  ;;  %v90_v58 = vsub.f32 %v70_v32, %v623_v42 }
  0x88   :  { %v130_v35 = vsub.f32 %v119_v33, %v602_v24  ;;  %v89_v29 = vsub.f32 %v611_v34, %v623_v42  ;;  %v676_v33 = vperm.slane %v594_v20, 7 }
  0x89   :  { %443 = vset.pattern.permute.xlu2 %v489_v13  ;;  %v96_v2 = vand.u32 2147483647, %v90_v58 }
  0x8a   :  { %v136_v37 = vand.u32 2147483647, %v130_v35  ;;  %442 = vset.pattern.permute.xlu1 %v489_v13  ;;  %325 = vperm.xlu2 %443, %v521_v1   ;;  %v95_v44 = vand.u32 2147483647, %v89_v29  ;;  %v57_v29 = vsub.f32 %v579_v15, %v599_v21 }
  0x8b   :  { %321 = vperm.xlu1 %442, %v544_v6  }
  0x8c   :  { %v616_v38 = vadd.f32 %v136_v37, %v62_v36  ;;  %v680_v37 = vperm.slane %v594_v20, 6 }
  0x8e   :  { %v78_v39 = vpop.permute.xlu1 %77 }
  0x8f   :  { %v618_v40 = vpop.permute.xlu0 %85  ;;  %v92_v45 = vsub.f32 %v78_v39, %v623_v42  ;;  %v58_v39 = vand.u32 2147483647, %v52_v28 }
  0x90   :  { %v146_v41 = vpop.permute.xlu2 %145 }
  0x91   :  { %v98_v53 = vand.u32 2147483647, %v92_v45  ;;  %v169_v31 = vsub.f32 %v146_v41, %v626_v43 }
  0x92   :  { %333 = vperm.xlu2 %443, %v516_v0   ;;  %v61_v0 = vand.u32 2147483647, %v55_v57 }
  0x93   :  { %329 = vperm.xlu1 %442, %v539_v5   ;;  %v175_v45 = vand.u32 2147483647, %v169_v31 }
  0x98   :  { %v103_v46 = vpop.permute.xlu1 %102  ;;  %v111_v47 = vpop.permute.xlu0 %110 }
  0x99   :  { %v128_v48 = vsub.f32 %v111_v47, %v602_v24  ;;  %v158_v49 = vpop.permute.xlu2 %157  ;;  %v126_v32 = vsub.f32 %v103_v46, %v602_v24  ;;  %v683_v47 = vperm.slane %v594_v20, 5 }
  0x9a   :  { %v172_v50 = vsub.f32 %v158_v49, %v626_v43 }
  0x9b   :  { %v134_v52 = vand.u32 2147483647, %v128_v48  ;;  %v132_v18 = vand.u32 2147483647, %v126_v32 }
  0x9c   :  { %v178_v54 = vand.u32 2147483647, %v172_v50 }
  0x9d   :  { %v632_v55 = vadd.f32 %v134_v52, %v60_v51  ;;  %v181_v51 = vadd.f32 %v175_v45, %v95_v44  ;;  %v138_v52 = vadd.f32 %v132_v18, %v58_v39  ;;  %v63_v45 = vand.u32 2147483647, %v57_v29 }
  0x9e   :  { %v634_v56 = vadd.f32 %v178_v54, %v98_v53 }
  0xa0   :  { %v115_v59 = vpop.permute.xlu1 %114 }
  0xa1   :  { %v129_v60 = vsub.f32 %v115_v59, %v602_v24  ;;  %v150_v61 = vpop.permute.xlu0 %149  ;;  %v639_v62 = vpop.permute.xlu2 %165 }
  0xa2   :  { %v170_v63 = vsub.f32 %v150_v61, %v626_v43  ;;  %v693_v61 = vstv %s757_s0  ;;  %s490_s0 = smov [#allocation4]  }
  0xa3   :  { %v135_v1 = vand.u32 2147483647, %v129_v60  ;;  %s395_s26 = sshll.u32 %s490_s0, 4  ;;  %s396_s26 = int_to_ptr.vmem [resolvable:$true] %s395_s26 }
  0xa4   :  { %v176_v3 = vand.u32 2147483647, %v170_v63 }
  0xa5   :  { %v642_v4 = vadd.f32 %v135_v1, %v61_v0 }
  0xa6   :  { %v644_v5 = vadd.f32 %v176_v3, %v96_v2  ;;  %v94_v2 = vsub.f32 %v618_v40, %v623_v42  ;;  %v174_v3 = vsub.f32 %v639_v62, %v626_v43 }
  0xa8   :  { %v123_v6 = vpop.permute.xlu1 %122 }
  0xa9   :  { %v646_v7 = vpop.permute.xlu2 %196 }
  0xaa   :  { %v189_v8 = vpop.permute.xlu0 %188  ;;  %v214_v15 = vsub.f32 %v646_v7, %v667_v27 }
  0xab   :  { %v212_v36 = vsub.f32 %v189_v8, %v667_v27  ;;  %v131_v8 = vsub.f32 %v123_v6, %v602_v24 }
  0xad   :  { %v218_v49 = vand.u32 2147483647, %v212_v36  ;;  %v180_v36 = vand.u32 2147483647, %v174_v3  ;;  %v137_v39 = vand.u32 2147483647, %v131_v8  ;;  %v93_v8 = vsub.f32 %v589_v19, %v623_v42 }
  0xaf   :  { %v224_v58 = vadd.f32 %v218_v49, %v138_v52  ;;  %v99_v19 = vand.u32 2147483647, %v93_v8 }
  0xb1   :  { %v648_v9 = vpop.permute.xlu1 %153  ;;  %v650_v10 = vpop.permute.xlu2 %204 }
  0xb2   :  { %v209_v11 = vpop.permute.xlu0 %208  ;;  %v171_v21 = vsub.f32 %v648_v9, %v626_v43 }
  0xb3   :  { %v217_v31 = vsub.f32 %v209_v11, %v667_v27  ;;  %v143_v11 = vadd.f32 %v137_v39, %v63_v45 }
  0xb5   :  { %v223_v24 = vand.u32 2147483647, %v217_v31  ;;  %v216_v31 = vsub.f32 %v650_v10, %v667_v27 }
  0xb9   :  { %v652_v12 = vpop.permute.xlu1 %161 }
  0xba   :  { %v654_v13 = vpop.permute.xlu2 %235 }
  0xbb   :  { %v656_v14 = vpop.permute.xlu0 %239 }
  0xc2   :  { %v658_v17 = vpop.permute.xlu1 %192  ;;  %v660_v22 = vpop.permute.xlu2 %247 }
  0xc4   :  { %v662_v23 = vpop.permute.xlu0 %278 }
  0xca   :  { %v664_v25 = vpop.permute.xlu1 %200 }
  0xcb   :  { %v275_v26 = vpop.permute.xlu2 %274 }
  0xcc   :  { %v298_v34 = vsub.f32 %v275_v26, %v680_v37 }
  0xcd   :  { %v318_v35 = vpop.permute.xlu0 %317 }
  0xce   :  { %v341_v41 = vsub.f32 %v318_v35, %v676_v33  ;;  %v304_v53 = vand.u32 2147483647, %v298_v34  ;;  %v100_v35 = vand.u32 2147483647, %v94_v2 }
  0xd0   :  { %v347_v57 = vand.u32 2147483647, %v341_v41  ;;  %v310_v60 = vadd.f32 %v304_v53, %v224_v58  ;;  %v186_v34 = vadd.f32 %v180_v36, %v100_v35  ;;  %v229_v53 = vadd.f32 %v223_v24, %v143_v11 }
  0xd1   :  { %v220_v58 = vand.u32 2147483647, %v214_v15  ;;  %v259_v35 = vsub.f32 %v660_v22, %v683_v47  ;;  %v213_v22 = vsub.f32 %v658_v17, %v667_v27 }
  0xd3   :  { %v232_v46 = vpop.permute.xlu1 %231  ;;  %v687_v48 = vpop.permute.xlu2 %286 }
  0xd4   :  { %v255_v50 = vsub.f32 %v232_v46, %v683_v47 }
  0xd5   :  { %v338_v28 = vpop.permute.xlu0 %337 }
  0xd6   :  { %v261_v54 = vand.u32 2147483647, %v255_v50  ;;  %v346_v44 = vsub.f32 %v338_v28, %v676_v33  ;;  %v91_v50 = vsub.f32 %v583_v16, %v623_v42  ;;  %v173_v16 = vsub.f32 %v652_v12, %v626_v43 }
  0xd7   :  { %v222_v42 = vand.u32 2147483647, %v216_v31 }
  0xd8   :  { %v267_v59 = vadd.f32 %v261_v54, %v181_v51  ;;  %v352_v49 = vand.u32 2147483647, %v346_v44  ;;  %v257_v51 = vsub.f32 %v656_v14, %v683_v47  ;;  %v179_v12 = vand.u32 2147483647, %v173_v16 }
  0xda   :  { %v353_v20 = vadd.f32 %v347_v57, %v267_v59  ;;  %v177_v57 = vand.u32 2147483647, %v171_v21  ;;  %v185_v24 = vadd.f32 %v179_v12, %v99_v19 }
  0xdb   :  { %v695_v63 = vpop.permute.xlu1 %243  ;;  %v295_v0 = vpop.permute.xlu2 %294 }
  0xdc   :  { %v359_v1 = vadd.f32 %v353_v20, %v310_v60  ;;  %v303_v40 = vsub.f32 %v295_v0, %v680_v37  ;;  %v97_v60 = vand.u32 2147483647, %v91_v50  ;;  %v263_v20 = vand.u32 2147483647, %v257_v51 }
  0xdd   :  { %v219_v51 = vand.u32 2147483647, %v213_v22 }
  0xde   :  { %v367_v26 = vmul.f32 %v693_v61, %v359_v1  ;;  %v309_v41 = vand.u32 2147483647, %v303_v40  ;;  %v183_v2 = vadd.f32 %v177_v57, %v97_v60  ;;  %v215_v60 = vsub.f32 %v664_v25, %v667_v27 }
  0xdf   :  { %v225_v57 = vadd.f32 %v219_v51, %v608_v30  ;;  %v301_v30 = vsub.f32 %v687_v48, %v680_v37 }
  0xe0   :  { %v373_v32 = vmul.f32 1.442695, %v367_v26  ;;  %v315_v59 = vadd.f32 %v309_v41, %v229_v53  ;;  %v226_v26 = vadd.f32 %v220_v58, %v632_v55  ;;  %v265_v55 = vand.u32 2147483647, %v259_v35 }
  0xe1   :  { %v307_v8 = vand.u32 2147483647, %v301_v30 }
  0xe2   :  { %444 = vpow2.f32 %v373_v32  ;;  %v269_v32 = vadd.f32 %v263_v20, %v183_v2  ;;  %v271_v15 = vadd.f32 %v265_v55, %v185_v24  ;;  %v221_v2 = vand.u32 2147483647, %v215_v60 }
  0xe3   :  { %v252_v62 = vpop.permute.xlu1 %251 }
  0xe4   :  { %v260_v6 = vsub.f32 %v252_v62, %v683_v47  ;;  %v326_v18 = vpop.permute.xlu2 %325 }
  0xe5   :  { %v343_v7 = vsub.f32 %v326_v18, %v676_v33 }
  0xe6   :  { %v266_v46 = vand.u32 2147483647, %v260_v6 }
  0xe7   :  { %v349_v3 = vand.u32 2147483647, %v343_v7 }
  0xe8   :  { %v445_v52 = vpop.eup %444  ;;  %v272_v54 = vadd.f32 %v266_v46, %v186_v34  ;;  %v228_v34 = vadd.f32 %v222_v42, %v616_v38  ;;  %v256_v46 = vsub.f32 %v654_v13, %v683_v47 }
  0xe9   :  { %385 = vst [vmem:[#allocation4] sm:$0xff] %v445_v52  ;;  %v355_v39 = vadd.f32 %v349_v3, %v269_v32  ;;  %v299_v52 = vsub.f32 %v662_v23, %v680_v37  ;;  %v258_v23 = vsub.f32 %v695_v63, %v683_v47  ;;  %v227_v47 = vadd.f32 %v221_v2, %v642_v4 }
  0xea   :  { %v358_v9 = vadd.f32 %v352_v49, %v272_v54  ;;  %v262_v54 = vand.u32 2147483647, %v256_v46 }
  0xeb   :  { %v305_v7 = vand.u32 2147483647, %v299_v52  ;;  %v264_v16 = vand.u32 2147483647, %v258_v23 }
  0xec   :  { %v364_v0 = vadd.f32 %v358_v9, %v315_v59  ;;  %v283_v1 = vpop.permute.xlu1 %282  ;;  %v334_v29 = vpop.permute.xlu2 %333  ;;  %v268_v9 = vadd.f32 %v262_v54, %v644_v5 }
  0xed   :  { %v300_v14 = vsub.f32 %v283_v1, %v680_v37  ;;  %v345_v44 = vsub.f32 %v334_v29, %v676_v33  ;;  %v270_v63 = vadd.f32 %v264_v16, %v634_v56  ;;  %v313_v29 = vadd.f32 %v307_v8, %v227_v47 }
  0xee   :  { %v372_v28 = vmul.f32 %v693_v61, %v364_v0  ;;  %v311_v0 = vadd.f32 %v305_v7, %v225_v57 }
  0xef   :  { %v306_v36 = vand.u32 2147483647, %v300_v14  ;;  %v351_v6 = vand.u32 2147483647, %v345_v44 }
  0xf0   :  { %v383_v43 = vmul.f32 1.442695, %v372_v28 }
  0xf1   :  { %v312_v40 = vadd.f32 %v306_v36, %v226_v26  ;;  %v357_v49 = vadd.f32 %v351_v6, %v271_v15 }
  0xf2   :  { %446 = vpow2.f32 %v383_v43 }
  0xf3   :  { %v361_v62 = vadd.f32 %v355_v39, %v312_v40 }
  0xf4   :  { %v291_v45 = vpop.permute.xlu1 %290 }
  0xf5   :  { %v369_v10 = vmul.f32 %v693_v61, %v361_v62  ;;  %v302_v18 = vsub.f32 %v291_v45, %v680_v37 }
  0xf7   :  { %v377_v21 = vmul.f32 1.442695, %v369_v10  ;;  %v308_v11 = vand.u32 2147483647, %v302_v18 }
  0xf8   :  { %v447_v41 = vpop.eup %446 }
  0xf9   :  { %390 = vst [vmem:[#allocation4 + $0x28] sm:$0xff] %v447_v41  ;;  %448 = vpow2.f32 %v377_v21  ;;  %v314_v50 = vadd.f32 %v308_v11, %v228_v34 }
  0xfb   :  { %v363_v53 = vadd.f32 %v357_v49, %v314_v50 }
  0xfd   :  { %v371_v17 = vmul.f32 %v693_v61, %v363_v53  ;;  %v322_v38 = vpop.permute.xlu1 %321 }
  0xfe   :  { %v342_v58 = vsub.f32 %v322_v38, %v676_v33 }
  0xff   :  { %v449_v59 = vpop.eup %448  ;;  %v381_v13 = vmul.f32 1.442695, %v371_v17 }
 0x100   :  { %387 = vst [vmem:[#allocation4 + $0x10] sm:$0xff] %v449_v59  ;;  %v348_v20 = vand.u32 2147483647, %v342_v58 }
 0x101   :  { %450 = vpow2.f32 %v381_v13 }
 0x102   :  { %v354_v1 = vadd.f32 %v348_v20, %v268_v9 }
 0x104   :  { %v360_v3 = vadd.f32 %v354_v1, %v311_v0 }
 0x105   :  { %v330_v14 = vpop.permute.xlu1 %329 }
 0x106   :  { %v368_v5 = vmul.f32 %v693_v61, %v360_v3  ;;  %v344_v25 = vsub.f32 %v330_v14, %v676_v33 }
 0x107   :  { %v451_v27 = vpop.eup %450 }
 0x108   :  { %389 = vst [vmem:[#allocation4 + $0x20] sm:$0xff] %v451_v27  ;;  %v375_v26 = vmul.f32 1.442695, %v368_v5  ;;  %v350_v28 = vand.u32 2147483647, %v344_v25 }
 0x10a   :  { %452 = vpow2.f32 %v375_v26  ;;  %v356_v37 = vadd.f32 %v350_v28, %v270_v63 }
 0x10c   :  { %v362_v48 = vadd.f32 %v356_v37, %v313_v29 }
 0x10e   :  { %v370_v31 = vmul.f32 %v693_v61, %v362_v48 }
 0x110   :  { %v453_v32 = vpop.eup %452  ;;  %v379_v35 = vmul.f32 1.442695, %v370_v31 }
 0x111   :  { %386 = vst [vmem:[#allocation4 + $0x8] sm:$0xff] %v453_v32 }
 0x112   :  { %454 = vpow2.f32 %v379_v35 }
 0x118   :  { %v455_v56 = vpop.eup %454 }
 0x119   :  { %388 = vst [vmem:[#allocation4 + $0x18] sm:$0xff] %v455_v56 }
 0x11a   :  { %403 = dma.vmem_to_hbm [thread:$0]  %s396_s26, 768, %s398_s29, [#allocation5], %s491_s30, %s491_s30, %s492_s4  }
 0x11b   :  { %480 = dma.done.wait [#allocation5], 768  }
 0x11c   :  { %481 = vsyncadd [#allocation5], 4294966528 }
 0x11d   :  { %408 = vsyncpa [#allocation5], 1 }

</bundles_post_ra>
